<compile_context>
chip_gen: v7x
topology: tpu7x:2x2x1
jax: 0.10.0
libtpu: 0.0.40
codegen_flags: <defaults>
</compile_context>

<pallas_src>
import functools

import jax
import jax.numpy as jnp
from jax import lax
from jax.experimental import pallas as pl
from jax.experimental.pallas import tpu as pltpu


# ---------------------------------------------------------------------------
# helpers
# ---------------------------------------------------------------------------

def _round_up(x, m):
    return ((x + m - 1) // m) * m


def _row_tile(M, tm):
    # As large as requested (default 256 for MXU occupancy) but no larger
    # than the 8-aligned padded token count.
    return min(tm, _round_up(M, 8))


def _pad_rows(x, multiple):
    M = x.shape[0]
    Mp = _round_up(M, multiple)
    if Mp != M:
        x = jnp.pad(x, ((0, Mp - M),) + ((0, 0),) * (x.ndim - 1))
    return x


def _gelu_tanh(x):
    # tanh-approx GELU (torch F.gelu(approximate='tanh'))
    c0 = 0.7978845608028654  # sqrt(2/pi)
    c1 = 0.044715
    return 0.5 * x * (1.0 + jnp.tanh(c0 * x * (1.0 + c1 * x * x)))


# ---------------------------------------------------------------------------
# LayerNorm kernel
# ---------------------------------------------------------------------------

def _layernorm_kernel(x_ref, g_ref, b_ref, o_ref, *, eps):
    x = x_ref[...].astype(jnp.float32)
    mean = jnp.mean(x, axis=-1, keepdims=True)
    xc = x - mean
    var = jnp.mean(xc * xc, axis=-1, keepdims=True)
    y = xc * lax.rsqrt(var + eps)
    y = y * g_ref[...].astype(jnp.float32) + b_ref[...].astype(jnp.float32)
    o_ref[...] = y.astype(o_ref.dtype)


def layernorm(x2d, gamma, beta, *, eps, tm=256):
    M, H = x2d.shape
    tm_eff = _row_tile(M, tm)
    xp = _pad_rows(x2d, tm_eff)
    Mp = xp.shape[0]
    out = pl.pallas_call(
        functools.partial(_layernorm_kernel, eps=eps),
        out_shape=jax.ShapeDtypeStruct((Mp, H), x2d.dtype),
        grid_spec=pltpu.PrefetchScalarGridSpec(
            num_scalar_prefetch=0,
            grid=(Mp // tm_eff,),
            in_specs=[
                pl.BlockSpec((tm_eff, H), lambda i: (i, 0)),
                pl.BlockSpec((1, H), lambda i: (0, 0)),
                pl.BlockSpec((1, H), lambda i: (0, 0)),
            ],
            out_specs=pl.BlockSpec((tm_eff, H), lambda i: (i, 0)),
        ),
        compiler_params=pltpu.CompilerParams(dimension_semantics=("parallel",)),
    )(xp, gamma.reshape(1, H), beta.reshape(1, H))
    return out[:M]


# ---------------------------------------------------------------------------
# Linear (x @ W + b [+ residual]) kernel — bf16 MXU operands, f32 accumulate
# ---------------------------------------------------------------------------

def _linear_kernel(x_ref, w_ref, b_ref, o_ref, *, compute_dtype):
    x = x_ref[...].astype(compute_dtype)
    w = w_ref[...].astype(compute_dtype)
    out = jnp.dot(x, w, preferred_element_type=jnp.float32)
    out = out + b_ref[...].astype(jnp.float32)
    o_ref[...] = out.astype(o_ref.dtype)


def _linear_residual_kernel(x_ref, w_ref, b_ref, r_ref, o_ref, *, compute_dtype):
    x = x_ref[...].astype(compute_dtype)
    w = w_ref[...].astype(compute_dtype)
    out = jnp.dot(x, w, preferred_element_type=jnp.float32)
    out = out + b_ref[...].astype(jnp.float32) + r_ref[...].astype(jnp.float32)
    o_ref[...] = out.astype(o_ref.dtype)


def linear(x2d, w, b, residual=None, *, tm=256, compute_dtype=jnp.bfloat16):
    M, K = x2d.shape
    N = w.shape[1]
    tm_eff = _row_tile(M, tm)
    xp = _pad_rows(x2d, tm_eff)
    Mp = xp.shape[0]
    b2d = b.reshape(1, N)

    x_spec = pl.BlockSpec((tm_eff, K), lambda i: (i, 0))
    w_spec = pl.BlockSpec((K, N), lambda i: (0, 0))
    b_spec = pl.BlockSpec((1, N), lambda i: (0, 0))
    o_spec = pl.BlockSpec((tm_eff, N), lambda i: (i, 0))

    cost = pl.CostEstimate(
        flops=2 * Mp * K * N,
        transcendentals=0,
        bytes_accessed=(Mp * K + K * N + Mp * N) * x2d.dtype.itemsize,
    )

    if residual is None:
        kernel = functools.partial(_linear_kernel, compute_dtype=compute_dtype)
        in_specs = [x_spec, w_spec, b_spec]
        args = (xp, w, b2d)
    else:
        rp = _pad_rows(residual, tm_eff)
        kernel = functools.partial(_linear_residual_kernel, compute_dtype=compute_dtype)
        in_specs = [x_spec, w_spec, b_spec,
                    pl.BlockSpec((tm_eff, N), lambda i: (i, 0))]
        args = (xp, w, b2d, rp)

    out = pl.pallas_call(
        kernel,
        out_shape=jax.ShapeDtypeStruct((Mp, N), x2d.dtype),
        grid_spec=pltpu.PrefetchScalarGridSpec(
            num_scalar_prefetch=0,
            grid=(Mp // tm_eff,),
            in_specs=in_specs,
            out_specs=o_spec,
        ),
        compiler_params=pltpu.CompilerParams(dimension_semantics=("parallel",)),
        cost_estimate=cost,
    )(*args)
    return out[:M]


# ---------------------------------------------------------------------------
# Self-attention kernel: one (batch, head) pair per grid step
# ---------------------------------------------------------------------------

def _attention_kernel(q_ref, k_ref, v_ref, o_ref, *, scale, compute_dtype):
    q = q_ref[0, 0].astype(compute_dtype)          # (S, Dh)
    k = k_ref[0, 0].astype(compute_dtype)          # (S, Dh)
    v = v_ref[0, 0].astype(compute_dtype)          # (S, Dh)
    # q @ k^T with contraction over Dh, f32 accumulation
    s = lax.dot_general(q, k, (((1,), (1,)), ((), ())),
                        preferred_element_type=jnp.float32) * scale
    m = jnp.max(s, axis=-1, keepdims=True)
    p = jnp.exp(s - m)
    p = p / jnp.sum(p, axis=-1, keepdims=True)
    out = jnp.dot(p.astype(compute_dtype), v, preferred_element_type=jnp.float32)
    o_ref[...] = out[None, None].astype(o_ref.dtype)


def attention(q, k, v, *, compute_dtype=jnp.bfloat16):
    # q, k, v: (B, nH, S, Dh)
    B, nH, S, Dh = q.shape
    scale = float(Dh) ** -0.5
    spec = pl.BlockSpec((1, 1, S, Dh), lambda b, h: (b, h, 0, 0))
    return pl.pallas_call(
        functools.partial(_attention_kernel, scale=scale,
                          compute_dtype=compute_dtype),
        out_shape=jax.ShapeDtypeStruct((B, nH, S, Dh), q.dtype),
        grid_spec=pltpu.PrefetchScalarGridSpec(
            num_scalar_prefetch=0,
            grid=(B, nH),
            in_specs=[spec, spec, spec],
            out_specs=spec,
        ),
        compiler_params=pltpu.CompilerParams(
            dimension_semantics=("parallel", "parallel")),
    )(q, k, v)


# ---------------------------------------------------------------------------
# Fused MLP kernel: fc1 + tanh-GELU + fc2 + residual
# grid = (token tiles, intermediate-dim slabs) with f32 VMEM accumulator
# ---------------------------------------------------------------------------

def _mlp_kernel(x_ref, w1_ref, b1_ref, w2_ref, b2_ref, r_ref, o_ref, acc_ref,
                *, compute_dtype):
    k = pl.program_id(1)

    @pl.when(k == 0)
    def _():
        acc_ref[...] = jnp.zeros_like(acc_ref)

    x = x_ref[...].astype(compute_dtype)
    h = jnp.dot(x, w1_ref[...].astype(compute_dtype),
                preferred_element_type=jnp.float32)
    h = h + b1_ref[...].astype(jnp.float32)
    h = _gelu_tanh(h)                               # elementwise over I slab
    acc_ref[...] += jnp.dot(h.astype(compute_dtype),
                            w2_ref[...].astype(compute_dtype),
                            preferred_element_type=jnp.float32)

    @pl.when(k == pl.num_programs(1) - 1)
    def _():
        out = acc_ref[...] + b2_ref[...].astype(jnp.float32)
        out = out + r_ref[...].astype(jnp.float32)
        o_ref[...] = out.astype(o_ref.dtype)


def siglip_mlp(x2d, w1, b1, w2, b2, residual, *, tm=256, ti=512,
               compute_dtype=jnp.bfloat16):
    M, H = x2d.shape
    I = w1.shape[1]
    tm_eff = _row_tile(M, tm)
    ti_eff = min(ti, I)
    Ip = _round_up(I, ti_eff)

    xp = _pad_rows(x2d, tm_eff)
    rp = _pad_rows(residual, tm_eff)
    Mp = xp.shape[0]

    if Ip != I:  # zero-pad the intermediate dim (zeros contribute nothing)
        w1 = jnp.pad(w1, ((0, 0), (0, Ip - I)))
        b1 = jnp.pad(b1, ((0, Ip - I),))
        w2 = jnp.pad(w2, ((0, Ip - I), (0, 0)))

    cost = pl.CostEstimate(
        flops=4 * Mp * H * Ip,
        transcendentals=Mp * Ip,
        bytes_accessed=(2 * Mp * H + 2 * H * Ip) * x2d.dtype.itemsize,
    )

    out = pl.pallas_call(
        functools.partial(_mlp_kernel, compute_dtype=compute_dtype),
        out_shape=jax.ShapeDtypeStruct((Mp, H), x2d.dtype),
        grid_spec=pltpu.PrefetchScalarGridSpec(
            num_scalar_prefetch=0,
            grid=(Mp // tm_eff, Ip // ti_eff),
            in_specs=[
                pl.BlockSpec((tm_eff, H), lambda i, k: (i, 0)),   # x tile
                pl.BlockSpec((H, ti_eff), lambda i, k: (0, k)),   # w1 slab
                pl.BlockSpec((1, ti_eff), lambda i, k: (0, k)),   # b1 slab
                pl.BlockSpec((ti_eff, H), lambda i, k: (k, 0)),   # w2 slab
                pl.BlockSpec((1, H), lambda i, k: (0, 0)),        # b2
                pl.BlockSpec((tm_eff, H), lambda i, k: (i, 0)),   # residual
            ],
            out_specs=pl.BlockSpec((tm_eff, H), lambda i, k: (i, 0)),
            scratch_shapes=[pltpu.VMEM((tm_eff, H), jnp.float32)],
        ),
        compiler_params=pltpu.CompilerParams(
            dimension_semantics=("parallel", "arbitrary")),
        cost_estimate=cost,
    )(xp, w1, b1.reshape(1, Ip), w2, b2.reshape(1, H), rp)
    return out[:M]


# ---------------------------------------------------------------------------
# Full SiglipVisionTransformer forward
# ---------------------------------------------------------------------------

def siglip_vision_transformer(pixel_values, params, *, patch_size, num_heads,
                              eps=1e-6, compute_dtype=jnp.bfloat16):
    B, C, Hi, Wi = pixel_values.shape
    p = patch_size
    gh, gw = Hi // p, Wi // p
    S = gh * gw

    # Patch embedding: Conv2d(stride=kernel=patch) == patchify + linear.
    patches = pixel_values.reshape(B, C, gh, p, gw, p)
    patches = patches.transpose(0, 2, 4, 1, 3, 5).reshape(B * S, C * p * p)
    h = linear(patches, params["patch_w"], params["patch_b"],
               compute_dtype=compute_dtype)                        # (B*S, H)
    Hdim = h.shape[-1]
    h = (h.reshape(B, S, Hdim) + params["pos_emb"][None]).reshape(B * S, Hdim)

    head_dim = Hdim // num_heads

    for layer in params["layers"]:
        # ----- self-attention block -----
        resid = h
        hn = layernorm(h, layer["ln1_g"], layer["ln1_b"], eps=eps)
        qkv = linear(hn, layer["w_qkv"], layer["b_qkv"],
                     compute_dtype=compute_dtype)                  # (B*S, 3H)
        q, k, v = jnp.split(qkv, 3, axis=-1)

        def to_heads(t):
            return t.reshape(B, S, num_heads, head_dim).transpose(0, 2, 1, 3)

        attn = attention(to_heads(q), to_heads(k), to_heads(v),
                         compute_dtype=compute_dtype)              # (B,nH,S,Dh)
        attn = attn.transpose(0, 2, 1, 3).reshape(B * S, Hdim)
        h = linear(attn, layer["w_o"], layer["b_o"], residual=resid,
                   compute_dtype=compute_dtype)

        # ----- MLP block -----
        resid = h
        hn = layernorm(h, layer["ln2_g"], layer["ln2_b"], eps=eps)
        h = siglip_mlp(hn, layer["w1"], layer["b1"], layer["w2"], layer["b2"],
                       resid, compute_dtype=compute_dtype)

    h = layernorm(h, params["post_ln_g"], params["post_ln_b"], eps=eps)
    return h.reshape(B, S, Hdim)


# ---------------------------------------------------------------------------
# Pure-JAX reference (matching bf16-operand / f32-accumulate matmuls)
# ---------------------------------------------------------------------------

def _ref_forward(pixel_values, params, *, patch_size, num_heads, eps,
                 compute_dtype=jnp.bfloat16):
    def mm(a, b):
        return jnp.dot(a.astype(compute_dtype), b.astype(compute_dtype),
                       preferred_element_type=jnp.float32)

    def ln(x, g, b):
        x = x.astype(jnp.float32)
        mean = jnp.mean(x, -1, keepdims=True)
        xc = x - mean
        var = jnp.mean(xc * xc, -1, keepdims=True)
        return xc * lax.rsqrt(var + eps) * g + b

    B, C, Hi, Wi = pixel_values.shape
    p = patch_size
    gh, gw = Hi // p, Wi // p
    S = gh * gw
    patches = pixel_values.reshape(B, C, gh, p, gw, p)
    patches = patches.transpose(0, 2, 4, 1, 3, 5).reshape(B * S, C * p * p)
    h = mm(patches, params["patch_w"]) + params["patch_b"]
    Hdim = h.shape[-1]
    h = (h.reshape(B, S, Hdim) + params["pos_emb"][None]).reshape(B * S, Hdim)
    head_dim = Hdim // num_heads
    scale = float(head_dim) ** -0.5

    for layer in params["layers"]:
        resid = h
        hn = ln(h, layer["ln1_g"], layer["ln1_b"])
        qkv = mm(hn, layer["w_qkv"]) + layer["b_qkv"]
        q, k, v = jnp.split(qkv, 3, axis=-1)

        def to_heads(t):
            return t.reshape(B, S, num_heads, head_dim).transpose(0, 2, 1, 3)

        q, k, v = to_heads(q), to_heads(k), to_heads(v)
        s = jnp.einsum("bhqd,bhkd->bhqk", q.astype(compute_dtype),
                       k.astype(compute_dtype),
                       preferred_element_type=jnp.float32) * scale
        m = jnp.max(s, -1, keepdims=True)
        pw = jnp.exp(s - m)
        pw = pw / jnp.sum(pw, -1, keepdims=True)
        attn = jnp.einsum("bhqk,bhkd->bhqd", pw.astype(compute_dtype),
                          v.astype(compute_dtype),
                          preferred_element_type=jnp.float32)
        attn = attn.transpose(0, 2, 1, 3).reshape(B * S, Hdim)
        h = mm(attn, layer["w_o"]) + layer["b_o"] + resid

        resid = h
        hn = ln(h, layer["ln2_g"], layer["ln2_b"])
        ff = _gelu_tanh(mm(hn, layer["w1"]) + layer["b1"])
        h = mm(ff, layer["w2"]) + layer["b2"] + resid

    h = ln(h, params["post_ln_g"], params["post_ln_b"])
    return h.reshape(B, S, Hdim)


# ---------------------------------------------------------------------------
# Self-test
# ---------------------------------------------------------------------------

if __name__ == "__main__":
    # Small config consistent with SiglipVisionConfig.
    image_size, patch_size, num_channels = 32, 8, 3
    hidden_size, num_heads, intermediate_size = 64, 4, 128
    num_layers, eps = 2, 1e-6
    B = 2
    S = (image_size // patch_size) ** 2     # 16 patches

    key = jax.random.PRNGKey(0)
    ks = iter(jax.random.split(key, 64))

    def rnd(shape, scl=0.05):
        return jax.random.normal(next(ks), shape, dtype=jnp.float32) * scl

    # nn.Linear / nn.Conv2d store (out, in); we store the transposed (in, out).
    params = {
        "patch_w": rnd((num_channels * patch_size * patch_size, hidden_size)),
        "patch_b": rnd((hidden_size,), 0.01),
        "pos_emb": rnd((S, hidden_size), 0.02),
        "post_ln_g": jnp.ones((hidden_size,), jnp.float32),
        "post_ln_b": jnp.zeros((hidden_size,), jnp.float32),
        "layers": [],
    }
    for _ in range(num_layers):
        params["layers"].append({
            "ln1_g": jnp.ones((hidden_size,), jnp.float32),
            "ln1_b": jnp.zeros((hidden_size,), jnp.float32),
            # q/k/v projections fused into a single (H, 3H) matrix
            "w_qkv": rnd((hidden_size, 3 * hidden_size)),
            "b_qkv": rnd((3 * hidden_size,), 0.01),
            "w_o": rnd((hidden_size, hidden_size)),
            "b_o": rnd((hidden_size,), 0.01),
            "ln2_g": jnp.ones((hidden_size,), jnp.float32),
            "ln2_b": jnp.zeros((hidden_size,), jnp.float32),
            "w1": rnd((hidden_size, intermediate_size)),
            "b1": rnd((intermediate_size,), 0.01),
            "w2": rnd((intermediate_size, hidden_size)),
            "b2": rnd((hidden_size,), 0.01),
        })

    pixel_values = jax.random.normal(
        next(ks), (B, num_channels, image_size, image_size), dtype=jnp.float32)

    out = siglip_vision_transformer(pixel_values, params,
                                    patch_size=patch_size,
                                    num_heads=num_heads, eps=eps)
    jax.block_until_ready(out)

    ref = _ref_forward(pixel_values, params, patch_size=patch_size,
                       num_heads=num_heads, eps=eps)
    assert out.shape == (B, S, hidden_size)
    max_err = jnp.max(jnp.abs(out - ref))
    assert jnp.allclose(out, ref, atol=2e-2, rtol=2e-2), \
        f"mismatch vs reference (max abs err {max_err})"

    print("KERNEL_OK")
</pallas_src>

<mosaic_0001>
module attributes {stable_mosaic.version = 11 : i64} {
  func.func @_linear_kernel(%arg0: i32, %arg1: memref<32x192xf32, #tpu.memory_space<vmem>>, %arg2: memref<192x64xf32, #tpu.memory_space<vmem>>, %arg3: memref<1x64xf32, #tpu.memory_space<vmem>>, %arg4: memref<32x64xf32, #tpu.memory_space<vmem>>) attributes {dimension_semantics = [#tpu.dimension_semantics<parallel>], iteration_bounds = array<i64: 1>, scalar_prefetch = 0 : i64, scratch_operands = 0 : i64, tpu.core_type = #tpu.core_type<tc>, window_params = [{transform_indices = @transform_0, window_bounds = array<i64: 32, 192>}, {pipeline_mode = #tpu.pipeline_mode<synchronous>, transform_indices = @transform_1, window_bounds = array<i64: 192, 64>}, {pipeline_mode = #tpu.pipeline_mode<synchronous>, transform_indices = @transform_2, window_bounds = array<i64: 1, 64>}, {transform_indices = @transform_3, window_bounds = array<i64: 32, 64>}]} {
    %c0 = arith.constant 0 : index
    %c0_0 = arith.constant 0 : index
    %0 = vector.load %arg1[%c0, %c0_0] : memref<32x192xf32, #tpu.memory_space<vmem>>, vector<32x192xf32>
    %1 = arith.truncf %0 : vector<32x192xf32> to vector<32x192xbf16>
    %c0_1 = arith.constant 0 : index
    %c0_2 = arith.constant 0 : index
    %2 = vector.load %arg2[%c0_1, %c0_2] : memref<192x64xf32, #tpu.memory_space<vmem>>, vector<192x64xf32>
    %3 = arith.truncf %2 : vector<192x64xf32> to vector<192x64xbf16>
    %cst = arith.constant dense<0.000000e+00> : vector<32x64xf32>
    %4 = tpu.matmul %1, %3, %cst {dimension_numbers = #tpu.dot_dimension_numbers<[1], [0], [0], [1], [0, 0, 1, 1], [], []>} : vector<32x192xbf16>, vector<192x64xbf16>, vector<32x64xf32> -> vector<32x64xf32>
    %c0_3 = arith.constant 0 : index
    %c0_4 = arith.constant 0 : index
    %5 = vector.load %arg3[%c0_3, %c0_4] : memref<1x64xf32, #tpu.memory_space<vmem>>, vector<1x64xf32>
    %6 = vector.broadcast %5 : vector<1x64xf32> to vector<32x64xf32>
    %7 = arith.addf %4, %6 : vector<32x64xf32>
    %c0_5 = arith.constant 0 : index
    %c0_6 = arith.constant 0 : index
    %8 = vector.load %arg4[%c0_5, %c0_6] : memref<32x64xf32, #tpu.memory_space<vmem>>, vector<32x64xf32>
    tpu.vector_store %arg4[%c0_5, %c0_6], %7 {strides = array<i32>} : memref<32x64xf32, #tpu.memory_space<vmem>>, vector<32x64xf32>,
    return
  }
  func.func @transform_0(%arg0: i32) -> (i32, i32) {
    %c0_i32 = arith.constant 0 : i32
    %c0_i32_0 = arith.constant 0 : i32
    return %arg0, %c0_i32 : i32, i32
  }
  func.func @transform_1(%arg0: i32) -> (i32, i32) {
    %c0_i32 = arith.constant 0 : i32
    %c0_i32_0 = arith.constant 0 : i32
    %c0_i32_1 = arith.constant 0 : i32
    return %c0_i32, %c0_i32_0 : i32, i32
  }
  func.func @transform_2(%arg0: i32) -> (i32, i32) {
    %c0_i32 = arith.constant 0 : i32
    %c0_i32_0 = arith.constant 0 : i32
    %c0_i32_1 = arith.constant 0 : i32
    return %c0_i32, %c0_i32_0 : i32, i32
  }
  func.func @transform_3(%arg0: i32) -> (i32, i32) {
    %c0_i32 = arith.constant 0 : i32
    %c0_i32_0 = arith.constant 0 : i32
    return %arg0, %c0_i32 : i32, i32
  }
}

</mosaic_0001>

<bundles_post_ra>
// kernel: tpu_custom_call.1
= control target key start
LH: loop header
LB: loop body
LE: loop exit
PB: predicated region body
PF: predicated region fallthrough
CT: control target
= control target key end

     0   :  { %v202_v3 = vmov 0   ;;  %vm71_vm0 = vcmask 523264   ;;  %s367_s0 = inlined_call_operand.vmem [shape: f32[32,192], index: 0, kind: input, shape index: {}]   ;;  %s368_s1 = inlined_call_operand.vmem [shape: f32[192,64], index: 1, kind: input, shape index: {}]   ;;  %s369_s2 = inlined_call_operand.vmem [shape: f32[1,64], index: 2, kind: input, shape index: {}]   ;;  %s370_s3 = inlined_call_operand.hbm [shape: f32[32,64], index: 3, kind: output, shape index: {}]  }
   0x1   :  { %v28_v0 = vld [vmem:[%s368_s1] sm:$0xff]  ;;  %v29_v1 = vld [vmem:[%s368_s1 + $0x8] sm:$0xff]  ;;  %v30_v2 = vld [vmem:[%s368_s1 + $0x10] sm:$0xff]  ;;  %78 = vmatprep.subr.bf16.mxu0 %v202_v3  ;;  %150 = vmatprep.subr.bf16.mxu1 %v202_v3 }
   0x2   :  { %v52_v4 = vpack.c.bf16 %v29_v1, %v28_v0  ;;  %v31_v5 = vld [vmem:[%s368_s1 + $0x18] sm:$0xff]  ;;  %v32_v7 = vld [vmem:[%s368_s1 + $0x20] sm:$0xff]  ;;  %v33_v8 = vld [vmem:[%s368_s1 + $0x28] sm:$0xff] }
   0x3   :  { %v53_v6 = vpack.c.bf16 %v31_v5, %v30_v2  ;;  %v54_v9 = vpack.c.bf16 %v33_v8, %v32_v7  ;;  %v34_v10 = vld [vmem:[%s368_s1 + $0x30] sm:$0xff]  ;;  %v35_v11 = vld [vmem:[%s368_s1 + $0x38] sm:$0xff]  ;;  %v17_v12 = vld [vmem:[%s367_s0 + $0x8] sm:$0xff] }
   0x4   :  { %79 = vmatpush1.bf16.msra.mxu0 %v52_v4  ;;  %162 = vmatpush1.bf16.msra.mxu1 %v52_v4  ;;  %v19_v13 = vld [vmem:[%s367_s0 + $0x18] sm:$0xff]  ;;  %v21_v14 = vld [vmem:[%s367_s0 + $0x28] sm:$0xff]  ;;  %v55_v18 = vpack.c.bf16 %v35_v11, %v34_v10 }
   0x5   :  { %80 = vmatprep.subr.bf16.mxu0 %v202_v3  ;;  %151 = vmatprep.subr.bf16.mxu1 %v202_v3  ;;  %v25_v15 = vpack.c.bf16 %v19_v13, %v17_v12  ;;  %v23_v16 = vld [vmem:[%s367_s0 + $0x38] sm:$0xff] }
   0x6   :  { %v27_v17 = vpack.c.bf16 %v23_v16, %v21_v14 }
   0x8   :  { %81 = vmatpush1.bf16.msra.mxu0 %v53_v6  ;;  %163 = vmatpush1.bf16.msra.mxu1 %v53_v6 }
   0x9   :  { %82 = vmatprep.subr.bf16.mxu0 %v202_v3  ;;  %152 = vmatprep.subr.bf16.mxu1 %v202_v3 }
   0xc   :  { %83 = vmatpush1.bf16.msra.mxu0 %v54_v9  ;;  %164 = vmatpush1.bf16.msra.mxu1 %v54_v9 }
   0xd   :  { %8 = vsyncpa [#allocation3], 0  ;;  %84 = vmatprep.subr.bf16.mxu0 %v202_v3  ;;  %153 = vmatprep.subr.bf16.mxu1 %v202_v3  ;;  %v36_v19 = vld [vmem:[%s368_s1 + $0x40] sm:$0xff]  ;;  %v37_v20 = vld [vmem:[%s368_s1 + $0x48] sm:$0xff]  ;;  %s203_s23 = smov [#allocation2]  }
   0xe   :  { %148 = vmatprep.mubr.msk.bf16.mxu0 %vm71_vm0, %v25_v15  ;;  %149 = vmatprep.mubr.msk.bf16.mxu1 %vm71_vm0, %v27_v17  ;;  %v56_v21 = vpack.c.bf16 %v37_v20, %v36_v19  ;;  %v38_v22 = vld [vmem:[%s368_s1 + $0x50] sm:$0xff]  ;;  %v39_v23 = vld [vmem:[%s368_s1 + $0x58] sm:$0xff]  ;;  %v40_v25 = vld [vmem:[%s368_s1 + $0x60] sm:$0xff]  ;;  %s136_s24 = sshll.u32 %s203_s23, 4  ;;  %s137_s24 = int_to_ptr.vmem [resolvable:$true] %s136_s24 }
   0xf   :  { %v57_v24 = vpack.c.bf16 %v39_v23, %v38_v22  ;;  %v41_v26 = vld [vmem:[%s368_s1 + $0x68] sm:$0xff]  ;;  %v42_v28 = vld [vmem:[%s368_s1 + $0x70] sm:$0xff]  ;;  %v43_v29 = vld [vmem:[%s368_s1 + $0x78] sm:$0xff]  ;;  %p183_p1 = scmp.lt.s32.totalorder %s137_s24, %s137_s24 }
  0x10   :  { %85 = vmatpush1.bf16.msra.mxu0 %v55_v18  ;;  %165 = vmatpush1.bf16.msra.mxu1 %v55_v18  ;;  %v58_v27 = vpack.c.bf16 %v41_v26, %v40_v25  ;;  %v59_v30 = vpack.c.bf16 %v43_v29, %v42_v28  ;;  %v44_v31 = vld [vmem:[%s368_s1 + $0x80] sm:$0xff]  ;;  %v45_v32 = vld [vmem:[%s368_s1 + $0x88] sm:$0xff]  ;;  %v46_v34 = vld [vmem:[%s368_s1 + $0x90] sm:$0xff] }
  0x11   :  { %86 = vmatprep.subr.bf16.mxu0 %v202_v3  ;;  %154 = vmatprep.subr.bf16.mxu1 %v202_v3  ;;  %v60_v33 = vpack.c.bf16 %v45_v32, %v44_v31  ;;  %v47_v35 = vld [vmem:[%s368_s1 + $0x98] sm:$0xff]  ;;  %v48_v37 = vld [vmem:[%s368_s1 + $0xa0] sm:$0xff]  ;;  %v49_v38 = vld [vmem:[%s368_s1 + $0xa8] sm:$0xff] }
  0x12   :  { %v61_v36 = vpack.c.bf16 %v47_v35, %v46_v34  ;;  %v62_v39 = vpack.c.bf16 %v49_v38, %v48_v37  ;;  %v50_v40 = vld [vmem:[%s368_s1 + $0xb0] sm:$0xff]  ;;  %v51_v41 = vld [vmem:[%s368_s1 + $0xb8] sm:$0xff]  ;;  %v16_v42 = vld [vmem:[%s367_s0] sm:$0xff] }
  0x13   :  { %v63_v43 = vpack.c.bf16 %v51_v41, %v50_v40  ;;  %v18_v44 = vld [vmem:[%s367_s0 + $0x10] sm:$0xff]  ;;  %v20_v45 = vld [vmem:[%s367_s0 + $0x20] sm:$0xff] }
  0x14   :  { %87 = vmatpush1.bf16.msra.mxu0 %v56_v21  ;;  %166 = vmatpush1.bf16.msra.mxu1 %v56_v21  ;;  %v22_v46 = vld [vmem:[%s367_s0 + $0x30] sm:$0xff]  ;;  %v24_v47 = vpack.c.bf16 %v18_v44, %v16_v42  ;;  %v147_v49 = vld [vmem:[%s369_s2] ss:$0 sm:$0xff]  ;;  %s178_s0 = scalar_lea.vmem %s137_s24, 512 }
  0x15   :  { %88 = vmatprep.subr.bf16.mxu0 %v202_v3  ;;  %155 = vmatprep.subr.bf16.mxu1 %v202_v3  ;;  %v26_v48 = vpack.c.bf16 %v22_v46, %v20_v45  ;;  %p179_p0 = scmp.ne.s32.totalorder %s137_s24, %s178_s0  ;;  %p184_p2 = scmp.lt.s32.totalorder %s178_s0, %s178_s0 }
  0x17   :  { %p185_p3 = por %p184_p2, %p183_p1 }
  0x18   :  { %89 = vmatpush1.bf16.msra.mxu0 %v57_v24  ;;  %167 = vmatpush1.bf16.msra.mxu1 %v57_v24 }
  0x19   :  { %90 = vmatprep.subr.bf16.mxu0 %v202_v3  ;;  %156 = vmatprep.subr.bf16.mxu1 %v202_v3  ;;  %p186_p4 = pnand %p185_p3, %p179_p0 }
  0x1c   :  { %91 = vmatpush1.bf16.msra.mxu0 %v58_v27  ;;  %168 = vmatpush1.bf16.msra.mxu1 %v58_v27 }
  0x1d   :  { %92 = vmatprep.subr.bf16.mxu0 %v202_v3  ;;  %157 = vmatprep.subr.bf16.mxu1 %v202_v3 }
  0x20   :  { %93 = vmatpush1.bf16.msra.mxu0 %v59_v30  ;;  %169 = vmatpush1.bf16.msra.mxu1 %v59_v30 }
  0x21   :  { %94 = vmatprep.subr.bf16.mxu0 %v202_v3  ;;  %158 = vmatprep.subr.bf16.mxu1 %v202_v3 }
  0x24   :  { %95 = vmatpush1.bf16.msra.mxu0 %v60_v33  ;;  %170 = vmatpush1.bf16.msra.mxu1 %v60_v33 }
  0x25   :  { %96 = vmatprep.subr.bf16.mxu0 %v202_v3  ;;  %159 = vmatprep.subr.bf16.mxu1 %v202_v3 }
  0x28   :  { %97 = vmatpush1.bf16.msra.mxu0 %v61_v36  ;;  %171 = vmatpush1.bf16.msra.mxu1 %v61_v36 }
  0x29   :  { %98 = vmatprep.subr.bf16.mxu0 %v202_v3  ;;  %160 = vmatprep.subr.bf16.mxu1 %v202_v3 }
  0x2c   :  { %99 = vmatpush1.bf16.msra.mxu0 %v62_v39  ;;  %172 = vmatpush1.bf16.msra.mxu1 %v62_v39 }
  0x2d   :  { %100 = vmatprep.subr.bf16.mxu0 %v202_v3  ;;  %161 = vmatprep.subr.bf16.mxu1 %v202_v3 }
  0x30   :  { %101 = vmatpush1.bf16.msra.mxu0 %v63_v43  ;;  %173 = vmatpush1.bf16.msra.mxu1 %v63_v43 }
  0x33   :  { %111 = vmatmul.mubr.bf16.vlgmr.msra.gmra.mrb[0].mxu0 %v24_v47  ;;  %119 = vmatmul.mubr.bf16.vlgmr.msra.gmra.mrb[0].mxu1 %v26_v48 }
 0x106   :  { %v112_v50 = vpop.f32.mrb[0].mxu0  ;;  %v120_v51 = vpop.f32.mrb[0].mxu1 }
 0x107   :  { %v113_v52 = vadd.f32 %v147_v49, %v112_v50  ;;  %v121_v53 = vadd.f32 %v147_v49, %v120_v51  ;;  %v114_v54 = vpop.f32.mrb[1].mxu0  ;;  %v122_v55 = vpop.f32.mrb[1].mxu1 }
 0x108   :  { %v115_v56 = vpop.f32.mrb[2].mxu0  ;;  %v123_v57 = vpop.f32.mrb[2].mxu1 }
 0x109   :  { %127 = vst.msk [vmem:[#allocation2] sm:$0xff] %vm71_vm0, %v113_v52  ;;  %129 = vst.msk [vmem:[#allocation2 + $0x10] sm:$0xff] %vm71_vm0, %v121_v53  ;;  %v116_v58 = vadd.f32 %v147_v49, %v115_v56  ;;  %v124_v59 = vadd.f32 %v147_v49, %v123_v57  ;;  %v117_v60 = vpop.f32.mrb[3].mxu0  ;;  %v125_v61 = vpop.f32.mrb[3].mxu1 }
 0x10b   :  { %128 = vst.msk [vmem:[#allocation2 + $0x8] sm:$0xff] %vm71_vm0, %v116_v58  ;;  %130 = vst.msk [vmem:[#allocation2 + $0x18] sm:$0xff] %vm71_vm0, %v124_v59 }
 0x10c   :  { %189 = shalt.err (!%p186_p4)
}
 0x10d   :  { %s190_s26 = scalar_lea.hbm %s370_s3, 512 }
 0x10e   :  { %p191_p5 = scmp.ne.s32.totalorder %s370_s3, %s190_s26  ;;  %p194_p6 = scmp.lt.u32.totalorder %s190_s26, %s370_s3 }
 0x110   :  { %p196_p7 = pnand %p194_p6, %p191_p5 }
 0x112   :  { %199 = shalt.err (!%p196_p7)
}
 0x113   :  { %s204_s4 = smov 128   ;;  %s205_s5 = smov 8  }
 0x114   :  { %142 = dma.vmem_to_hbm [thread:$0]  %s137_s24, 512, %s370_s3, [#allocation3], %s204_s4, %s204_s4, %s205_s5  }
 0x115   :  { %200 = dma.done.wait [#allocation3], 512  }
 0x116   :  { %201 = vsyncadd [#allocation3], 4294966784 }
 0x117   :  { %146 = vsyncpa [#allocation3], 1 }

</bundles_post_ra>
